<compile_context>
chip_gen: v6e
topology: v6e:2x2x1
jax: 0.10.0
libtpu: 0.0.40
codegen_flags: <defaults>
</compile_context>

<pallas_src>
import jax
import jax.numpy as jnp
from jax import lax
from jax.experimental import pallas as pl
from jax.experimental.pallas import tpu as pltpu

EPS = 1e-5


def _make_kernel(dim, rest):
    inv_dim = 1.0 / float(dim)
    inv_rest = 1.0 / float(rest)

    def kernel(x_ref, g_ref, b_ref, o_ref):
        x = x_ref[...].astype(jnp.float32)            # (tm, in_dim)
        in_dim = x.shape[-1]

        # Lane mask selecting the first `dim` features (built once per tile).
        lane = lax.broadcasted_iota(jnp.int32, (1, in_dim), 1)
        mask = lane < dim                              # (1, in_dim) bool

        # Single-pass fused statistics: sum(x) and sum(x*x), split by mask.
        xx = x * x
        s1 = jnp.sum(jnp.where(mask, x, 0.0), axis=-1, keepdims=True)
        q1 = jnp.sum(jnp.where(mask, xx, 0.0), axis=-1, keepdims=True)
        s_all = jnp.sum(x, axis=-1, keepdims=True)
        q_all = jnp.sum(xx, axis=-1, keepdims=True)
        s2 = s_all - s1
        q2 = q_all - q1

        mu1 = s1 * inv_dim
        mu2 = s2 * inv_rest
        var1 = jnp.maximum(q1 * inv_dim - mu1 * mu1, 0.0)
        var2 = jnp.maximum(q2 * inv_rest - mu2 * mu2, 0.0)
        inv1 = lax.rsqrt(var1 + EPS)
        inv2 = lax.rsqrt(var2 + EPS)

        # Per-lane selected mean / inv-std (broadcast (tm,1) vs (1,in_dim)).
        mu = jnp.where(mask, mu1, mu2)                 # (tm, in_dim)
        inv = jnp.where(mask, inv1, inv2)              # (tm, in_dim)

        g = g_ref[...]                                 # (1, in_dim), hoisted
        b = b_ref[...]                                 # (1, in_dim)

        # One full-width lane-dense store.
        o_ref[...] = ((x - mu) * inv * g + b).astype(o_ref.dtype)

    return kernel


def partial_layernorm(x, gamma1, beta1, gamma2, beta2, *, dim,
                      tile_rows=None, vmem_limit_bytes=48 * 1024 * 1024):
    """x: (B, in_dim) float32. gamma1/beta1: (dim,). gamma2/beta2: (in_dim-dim,)."""
    B, in_dim = x.shape
    rest = in_dim - dim
    assert gamma1.shape == (dim,) and beta1.shape == (dim,)
    assert gamma2.shape == (rest,) and beta2.shape == (rest,)

    # Fuse the affine parameters host-side into single full-width rows.
    gamma = jnp.concatenate([gamma1, gamma2]).reshape(1, in_dim).astype(jnp.float32)
    beta = jnp.concatenate([beta1, beta2]).reshape(1, in_dim).astype(jnp.float32)

    itemsize = jnp.dtype(x.dtype).itemsize
    if tile_rows is None:
        # Target ~8 MiB per x tile: double-buffered in + out ~= 32 MiB,
        # comfortably within v7x's 64 MiB physical VMEM (and v5e/v6e's 128 MiB).
        target_tile_bytes = 8 * 1024 * 1024
        max_rows = max(8, target_tile_bytes // (in_dim * itemsize))
        max_rows = (max_rows // 8) * 8                 # sublane multiple
        b_rounded = ((B + 7) // 8) * 8
        tile_rows = int(min(max_rows, b_rounded))
    assert tile_rows % 8 == 0, "tile_rows must be a multiple of 8 (f32 sublane)"

    # Pad the batch so the grid tiles evenly; padded rows are dropped at the end.
    Bp = ((B + tile_rows - 1) // tile_rows) * tile_rows
    x_in = jnp.pad(x, ((0, Bp - B), (0, 0))) if Bp != B else x

    grid = (Bp // tile_rows,)

    out = pl.pallas_call(
        _make_kernel(dim, rest),
        out_shape=jax.ShapeDtypeStruct((Bp, in_dim), x.dtype),
        grid_spec=pl.GridSpec(
            grid=grid,
            in_specs=[
                pl.BlockSpec((tile_rows, in_dim), lambda i: (i, 0)),
                pl.BlockSpec((1, in_dim), lambda i: (0, 0)),
                pl.BlockSpec((1, in_dim), lambda i: (0, 0)),
            ],
            out_specs=pl.BlockSpec((tile_rows, in_dim), lambda i: (i, 0)),
        ),
        compiler_params=pltpu.CompilerParams(
            dimension_semantics=("parallel",),
            vmem_limit_bytes=vmem_limit_bytes,
        ),
    )(x_in, gamma, beta)

    return out[:B] if Bp != B else out


def partial_layernorm_ref(x, gamma1, beta1, gamma2, beta2, *, dim):
    """Pure-JAX reference mirroring the PyTorch module."""
    def ln(v, g, b):
        mu = jnp.mean(v, axis=-1, keepdims=True)
        var = jnp.mean((v - mu) ** 2, axis=-1, keepdims=True)
        return (v - mu) / jnp.sqrt(var + EPS) * g + b

    y1 = ln(x[..., :dim], gamma1, beta1)
    y2 = ln(x[..., dim:], gamma2, beta2)
    return jnp.concatenate([y1, y2], axis=-1)


if __name__ == "__main__":
    key = jax.random.PRNGKey(0)
    k_x, k_g1, k_b1, k_g2, k_b2 = jax.random.split(key, 5)

    # Small shapes consistent with the module: batch=16, in_dim=32, dim=8.
    B, in_dim, dim = 16, 32, 8
    rest = in_dim - dim

    x = jax.random.normal(k_x, (B, in_dim), dtype=jnp.float32)

    # Deterministic synthetic LayerNorm parameters (perturbed from the
    # PyTorch defaults gamma=1, beta=0 so the affine path is exercised).
    gamma1 = 1.0 + 0.1 * jax.random.normal(k_g1, (dim,), dtype=jnp.float32)
    beta1 = 0.1 * jax.random.normal(k_b1, (dim,), dtype=jnp.float32)
    gamma2 = 1.0 + 0.1 * jax.random.normal(k_g2, (rest,), dtype=jnp.float32)
    beta2 = 0.1 * jax.random.normal(k_b2, (rest,), dtype=jnp.float32)

    y = partial_layernorm(x, gamma1, beta1, gamma2, beta2, dim=dim)
    y = jax.block_until_ready(y)

    y_ref = partial_layernorm_ref(x, gamma1, beta1, gamma2, beta2, dim=dim)
    assert y.shape == (B, in_dim)
    assert jnp.allclose(y, y_ref, atol=1e-4, rtol=1e-4), "mismatch vs reference"

    print("KERNEL_OK")
</pallas_src>

<mosaic_0001>
module attributes {stable_mosaic.version = 11 : i64} {
  func.func @kernel(%arg0: i32, %arg1: memref<16x32xf32, #tpu.memory_space<vmem>>, %arg2: memref<1x32xf32, #tpu.memory_space<vmem>>, %arg3: memref<1x32xf32, #tpu.memory_space<vmem>>, %arg4: memref<16x32xf32, #tpu.memory_space<vmem>>) attributes {dimension_semantics = [#tpu.dimension_semantics<parallel>], iteration_bounds = array<i64: 1>, scalar_prefetch = 0 : i64, scratch_operands = 0 : i64, tpu.core_type = #tpu.core_type<tc>, window_params = [{transform_indices = @transform_0, window_bounds = array<i64: 16, 32>}, {pipeline_mode = #tpu.pipeline_mode<synchronous>, transform_indices = @transform_1, window_bounds = array<i64: 1, 32>}, {pipeline_mode = #tpu.pipeline_mode<synchronous>, transform_indices = @transform_2, window_bounds = array<i64: 1, 32>}, {transform_indices = @transform_3, window_bounds = array<i64: 16, 32>}]} {
    %c0 = arith.constant 0 : index
    %c0_0 = arith.constant 0 : index
    %0 = vector.load %arg1[%c0, %c0_0] : memref<16x32xf32, #tpu.memory_space<vmem>>, vector<16x32xf32>
    %1 = tpu.iota {dimensions = array<i32: 1>} : vector<1x32xi32>
    %c8_i32 = arith.constant 8 : i32
    %2 = vector.broadcast %c8_i32 : i32 to vector<1x32xi32>
    %3 = arith.cmpi slt, %1, %2 : vector<1x32xi32>
    %4 = arith.mulf %0, %0 : vector<16x32xf32>
    %cst = arith.constant 0.000000e+00 : f32
    %5 = vector.shape_cast %3 : vector<1x32xi1> to vector<1x32xi1>
    %6 = vector.broadcast %5 : vector<1x32xi1> to vector<16x32xi1>
    %7 = vector.broadcast %cst : f32 to vector<16x32xf32>
    %8 = arith.select %6, %0, %7 : vector<16x32xi1>, vector<16x32xf32>
    %cst_1 = arith.constant dense<0.000000e+00> : vector<16xf32>
    %9 = vector.multi_reduction <add>, %8, %cst_1 [1] : vector<16x32xf32> to vector<16xf32>
    %10 = vector.shape_cast %9 : vector<16xf32> to vector<16x1xf32>
    %cst_2 = arith.constant 0.000000e+00 : f32
    %11 = vector.shape_cast %3 : vector<1x32xi1> to vector<1x32xi1>
    %12 = vector.broadcast %11 : vector<1x32xi1> to vector<16x32xi1>
    %13 = vector.broadcast %cst_2 : f32 to vector<16x32xf32>
    %14 = arith.select %12, %4, %13 : vector<16x32xi1>, vector<16x32xf32>
    %cst_3 = arith.constant dense<0.000000e+00> : vector<16xf32>
    %15 = vector.multi_reduction <add>, %14, %cst_3 [1] : vector<16x32xf32> to vector<16xf32>
    %16 = vector.shape_cast %15 : vector<16xf32> to vector<16x1xf32>
    %cst_4 = arith.constant dense<0.000000e+00> : vector<16xf32>
    %17 = vector.multi_reduction <add>, %0, %cst_4 [1] : vector<16x32xf32> to vector<16xf32>
    %18 = vector.shape_cast %17 : vector<16xf32> to vector<16x1xf32>
    %cst_5 = arith.constant dense<0.000000e+00> : vector<16xf32>
    %19 = vector.multi_reduction <add>, %4, %cst_5 [1] : vector<16x32xf32> to vector<16xf32>
    %20 = vector.shape_cast %19 : vector<16xf32> to vector<16x1xf32>
    %21 = arith.subf %18, %10 : vector<16x1xf32>
    %22 = arith.subf %20, %16 : vector<16x1xf32>
    %cst_6 = arith.constant 1.250000e-01 : f32
    %23 = vector.broadcast %cst_6 : f32 to vector<16x1xf32>
    %24 = arith.mulf %10, %23 : vector<16x1xf32>
    %cst_7 = arith.constant 0.0416666679 : f32
    %25 = vector.broadcast %cst_7 : f32 to vector<16x1xf32>
    %26 = arith.mulf %21, %25 : vector<16x1xf32>
    %cst_8 = arith.constant 1.250000e-01 : f32
    %27 = vector.broadcast %cst_8 : f32 to vector<16x1xf32>
    %28 = arith.mulf %16, %27 : vector<16x1xf32>
    %29 = arith.mulf %24, %24 : vector<16x1xf32>
    %30 = arith.subf %28, %29 : vector<16x1xf32>
    %cst_9 = arith.constant 0.000000e+00 : f32
    %31 = vector.broadcast %cst_9 : f32 to vector<16x1xf32>
    %32 = arith.maximumf %30, %31 : vector<16x1xf32>
    %cst_10 = arith.constant 0.0416666679 : f32
    %33 = vector.broadcast %cst_10 : f32 to vector<16x1xf32>
    %34 = arith.mulf %22, %33 : vector<16x1xf32>
    %35 = arith.mulf %26, %26 : vector<16x1xf32>
    %36 = arith.subf %34, %35 : vector<16x1xf32>
    %cst_11 = arith.constant 0.000000e+00 : f32
    %37 = vector.broadcast %cst_11 : f32 to vector<16x1xf32>
    %38 = arith.maximumf %36, %37 : vector<16x1xf32>
    %cst_12 = arith.constant 9.99999974E-6 : f32
    %39 = vector.broadcast %cst_12 : f32 to vector<16x1xf32>
    %40 = arith.addf %32, %39 : vector<16x1xf32>
    %41 = math.rsqrt %40 : vector<16x1xf32>
    %cst_13 = arith.constant 9.99999974E-6 : f32
    %42 = vector.broadcast %cst_13 : f32 to vector<16x1xf32>
    %43 = arith.addf %38, %42 : vector<16x1xf32>
    %44 = math.rsqrt %43 : vector<16x1xf32>
    %45 = vector.shape_cast %3 : vector<1x32xi1> to vector<1x32xi1>
    %46 = vector.broadcast %45 : vector<1x32xi1> to vector<16x32xi1>
    %47 = vector.shape_cast %24 : vector<16x1xf32> to vector<16x1xf32>
    %48 = vector.broadcast %47 : vector<16x1xf32> to vector<16x32xf32>
    %49 = vector.shape_cast %26 : vector<16x1xf32> to vector<16x1xf32>
    %50 = vector.broadcast %49 : vector<16x1xf32> to vector<16x32xf32>
    %51 = arith.select %46, %48, %50 : vector<16x32xi1>, vector<16x32xf32>
    %52 = vector.shape_cast %3 : vector<1x32xi1> to vector<1x32xi1>
    %53 = vector.broadcast %52 : vector<1x32xi1> to vector<16x32xi1>
    %54 = vector.shape_cast %41 : vector<16x1xf32> to vector<16x1xf32>
    %55 = vector.broadcast %54 : vector<16x1xf32> to vector<16x32xf32>
    %56 = vector.shape_cast %44 : vector<16x1xf32> to vector<16x1xf32>
    %57 = vector.broadcast %56 : vector<16x1xf32> to vector<16x32xf32>
    %58 = arith.select %53, %55, %57 : vector<16x32xi1>, vector<16x32xf32>
    %c0_14 = arith.constant 0 : index
    %c0_15 = arith.constant 0 : index
    %59 = vector.load %arg2[%c0_14, %c0_15] : memref<1x32xf32, #tpu.memory_space<vmem>>, vector<1x32xf32>
    %c0_16 = arith.constant 0 : index
    %c0_17 = arith.constant 0 : index
    %60 = vector.load %arg3[%c0_16, %c0_17] : memref<1x32xf32, #tpu.memory_space<vmem>>, vector<1x32xf32>
    %61 = arith.subf %0, %51 : vector<16x32xf32>
    %62 = arith.mulf %61, %58 : vector<16x32xf32>
    %63 = vector.broadcast %59 : vector<1x32xf32> to vector<16x32xf32>
    %64 = arith.mulf %62, %63 : vector<16x32xf32>
    %65 = vector.broadcast %60 : vector<1x32xf32> to vector<16x32xf32>
    %66 = arith.addf %64, %65 : vector<16x32xf32>
    %c0_18 = arith.constant 0 : index
    %c0_19 = arith.constant 0 : index
    %67 = vector.load %arg4[%c0_18, %c0_19] : memref<16x32xf32, #tpu.memory_space<vmem>>, vector<16x32xf32>
    tpu.vector_store %arg4[%c0_18, %c0_19], %66 {strides = array<i32>} : memref<16x32xf32, #tpu.memory_space<vmem>>, vector<16x32xf32>,
    return
  }
  func.func @transform_0(%arg0: i32) -> (i32, i32) {
    %c0_i32 = arith.constant 0 : i32
    %c0_i32_0 = arith.constant 0 : i32
    return %arg0, %c0_i32 : i32, i32
  }
  func.func @transform_1(%arg0: i32) -> (i32, i32) {
    %c0_i32 = arith.constant 0 : i32
    %c0_i32_0 = arith.constant 0 : i32
    %c0_i32_1 = arith.constant 0 : i32
    return %c0_i32, %c0_i32_0 : i32, i32
  }
  func.func @transform_2(%arg0: i32) -> (i32, i32) {
    %c0_i32 = arith.constant 0 : i32
    %c0_i32_0 = arith.constant 0 : i32
    %c0_i32_1 = arith.constant 0 : i32
    return %c0_i32, %c0_i32_0 : i32, i32
  }
  func.func @transform_3(%arg0: i32) -> (i32, i32) {
    %c0_i32 = arith.constant 0 : i32
    %c0_i32_0 = arith.constant 0 : i32
    return %arg0, %c0_i32 : i32, i32
  }
}

</mosaic_0001>

<bundles_post_ra>
// kernel: tpu_custom_call.1
= control target key start
LH: loop header
LB: loop body
LE: loop exit
PB: predicated region body
PF: predicated region fallthrough
CT: control target
= control target key end

     0   :  { %8 = vsyncpa [#allocation3], 0  ;;  %s287_s0 = inlined_call_operand.hbm [shape: f32[16,32], index: 0, kind: input, shape index: {}]   ;;  %s288_s1 = inlined_call_operand.vmem [shape: f32[1,32], index: 1, kind: input, shape index: {}]   ;;  %s289_s2 = inlined_call_operand.vmem [shape: f32[1,32], index: 2, kind: input, shape index: {}]   ;;  %s290_s3 = inlined_call_operand.hbm [shape: f32[16,32], index: 3, kind: output, shape index: {}]  }
   0x1   :  { %9 = vsyncpa [#allocation4], 0  ;;  %s202_s12 = smov [#allocation2]  }
   0x2   :  { %s15_s13 = sshll.u32 %s202_s12, 4  ;;  %s16_s13 = int_to_ptr.vmem [resolvable:$true] %s15_s13 }
   0x3   :  { %s166_s14 = scalar_lea.vmem %s16_s13, 256  ;;  %p171_p1 = scmp.lt.s32.totalorder %s16_s13, %s16_s13 }
   0x4   :  { %p167_p0 = scmp.ne.s32.totalorder %s16_s13, %s166_s14  ;;  %p172_p2 = scmp.lt.s32.totalorder %s166_s14, %s166_s14 }
   0x6   :  { %p173_p3 = por %p172_p2, %p171_p1 }
   0x8   :  { %p174_p4 = pnand %p173_p3, %p167_p0 }
   0xa   :  { %177 = shalt.err (!%p174_p4)
}
   0xb   :  { %s203_s15 = smov 128   ;;  %s204_s16 = smov 8  }
   0xc   :  { %21 = dma.hbm_to_vmem [thread:$0]  %s287_s0, 256, %s16_s13, [#allocation3], %s203_s15, %s203_s15, %s204_s16  }
   0xd   :  { %198 = dma.done.wait [#allocation3], 256  }
   0xe   :  { %199 = vsyncadd [#allocation3], 4294967040  ;;  %v31_v0 = vlaneseq  ;;  %vm40_vm0 = vcmask 261120   ;;  %v235_v2 = vld [vmem:[#allocation2] sm:$0xff]  ;;  %v237_v3 = vld [vmem:[#allocation2 + $0x8] sm:$0xff]  ;;  %s205_s22 = smov [#allocation5]  }
   0xf   :  { %v55_v4 = vsel %vm40_vm0, %v235_v2, 0.0  ;;  %v35_v8 = vmul.f32 %v237_v3, %v237_v3  ;;  %v34_v9 = vmul.f32 %v235_v2, %v235_v2  ;;  %v58_v10 = vsel %vm40_vm0, %v237_v3, 0.0  ;;  %v144_v63 = vld [vmem:[%s288_s1] ss:$0 sm:$0xff]  ;;  %s132_s23 = sshll.u32 %s205_s22, 4  ;;  %s133_s23 = int_to_ptr.vmem [resolvable:$true] %s132_s23 }
  0x10   :  { %v232_v1 = vand.u32 127, %v31_v0  ;;  %56 = vadd.xlane.f32.xlu1 %v55_v4  ;;  %s178_s1 = scalar_lea.vmem %s133_s23, 256  ;;  %p183_p6 = scmp.lt.s32.totalorder %s133_s23, %s133_s23 }
  0x11   :  { %v64_v16 = vsel %vm40_vm0, %v35_v8, 0.0  ;;  %v61_v17 = vsel %vm40_vm0, %v34_v9, 0.0  ;;  %p179_p5 = scmp.ne.s32.totalorder %s133_s23, %s178_s1  ;;  %p184_p7 = scmp.lt.s32.totalorder %s178_s1, %s178_s1 }
  0x12   :  { %vm33_vm1 = vcmp.lt.s32.totalorder %v232_v1, 8 }
  0x13   :  { %v38_v5 = vsel %vm33_vm1, %v235_v2, 0.0  ;;  %v39_v6 = vsel %vm33_vm1, %v237_v3, 0.0  ;;  %v48_v12 = vsel %vm33_vm1, %v35_v8, 0.0  ;;  %v47_v13 = vsel %vm33_vm1, %v34_v9, 0.0  ;;  %p185_p8 = por %p184_p7, %p183_p6 }
  0x14   :  { %v41_v7 = vsel %vm40_vm0, %v38_v5, 0.0  ;;  %v44_v11 = vsel %vm40_vm0, %v39_v6, 0.0  ;;  %59 = vadd.xlane.f32.xlu1 %v58_v10  ;;  %v52_v14 = vsel %vm40_vm0, %v48_v12, 0.0  ;;  %v49_v15 = vsel %vm40_vm0, %v47_v13, 0.0  ;;  %v145_v5 = vld [vmem:[%s289_s2] ss:$0 sm:$0xff] }
  0x15   :  { %42 = vadd.xlane.f32.xlu0 %v41_v7  ;;  %p186_p9 = pnand %p185_p8, %p179_p5 }
  0x18   :  { %53 = vadd.xlane.f32.xlu1 %v52_v14 }
  0x19   :  { %45 = vadd.xlane.f32.xlu0 %v44_v11 }
  0x1c   :  { %65 = vadd.xlane.f32.xlu1 %v64_v16 }
  0x1d   :  { %50 = vadd.xlane.f32.xlu0 %v49_v15 }
  0x21   :  { %62 = vadd.xlane.f32.xlu0 %v61_v17 }
  0x99   :  { %v57_v18 = vpop.xlane.xlu1 %56 }
  0x9d   :  { %v60_v20 = vpop.xlane.xlu1 %59 }
  0x9e   :  { %v43_v19 = vpop.xlane.xlu0 %42 }
  0x9f   :  { %v71_v22 = vmul.f32 0.125, %v43_v19  ;;  %v67_v25 = vsub.f32 %v57_v18, %v43_v19 }
  0xa1   :  { %v54_v27 = vpop.xlane.xlu1 %53  ;;  %v77_v30 = vmul.f32 %v71_v22, %v71_v22  ;;  %v73_v34 = vmul.f32 0.041666668, %v67_v25 }
  0xa2   :  { %v46_v21 = vpop.xlane.xlu0 %45  ;;  %v76_v28 = vmul.f32 0.125, %v54_v27 }
  0xa3   :  { %v72_v23 = vmul.f32 0.125, %v46_v21  ;;  %v68_v24 = vsub.f32 %v60_v20, %v46_v21  ;;  %v85_v44 = vmul.f32 %v73_v34, %v73_v34  ;;  %v99_v56 = vsel %vm33_vm1, %v71_v22, %v73_v34 }
  0xa4   :  { %v105_v61 = vsub.f32 %v235_v2, %v99_v56 }
  0xa5   :  { %v78_v26 = vmul.f32 %v72_v23, %v72_v23  ;;  %v74_v32 = vmul.f32 0.041666668, %v68_v24  ;;  %v66_v36 = vpop.xlane.xlu1 %65 }
  0xa6   :  { %v51_v29 = vpop.xlane.xlu0 %50  ;;  %v70_v38 = vsub.f32 %v66_v36, %v54_v27 }
  0xa7   :  { %v75_v31 = vmul.f32 0.125, %v51_v29  ;;  %v80_v33 = vsub.f32 %v76_v28, %v78_v26  ;;  %v86_v42 = vmul.f32 %v74_v32, %v74_v32  ;;  %v100_v54 = vsel %vm33_vm1, %v72_v23, %v74_v32 }
  0xa8   :  { %v84_v43 = vmul.f32 0.041666668, %v70_v38  ;;  %v106_v59 = vsub.f32 %v237_v3, %v100_v54 }
  0xa9   :  { %v79_v35 = vsub.f32 %v75_v31, %v77_v30  ;;  %v82_v37 = vmax.f32 %v80_v33, 0.0 }
  0xaa   :  { %v63_v39 = vpop.xlane.xlu0 %62  ;;  %v88_v47 = vsub.f32 %v84_v43, %v86_v42 }
  0xab   :  { %v81_v40 = vmax.f32 %v79_v35, 0.0  ;;  %v69_v41 = vsub.f32 %v63_v39, %v51_v29  ;;  %v92_v46 = vadd.f32 1e-05, %v82_v37 }
  0xac   :  { %v90_v50 = vmax.f32 %v88_v47, 0.0 }
  0xad   :  { %v83_v45 = vmul.f32 0.041666668, %v69_v41  ;;  %v91_v48 = vadd.f32 1e-05, %v81_v40  ;;  %150 = vrsqrt.f32 %v92_v46 }
  0xae   :  { %v96_v52 = vadd.f32 1e-05, %v90_v50 }
  0xaf   :  { %v87_v49 = vsub.f32 %v83_v45, %v85_v44  ;;  %152 = vrsqrt.f32 %v91_v48 }
  0xb0   :  { %154 = vrsqrt.f32 %v96_v52 }
  0xb1   :  { %v89_v51 = vmax.f32 %v87_v49, 0.0 }
  0xb3   :  { %v95_v53 = vadd.f32 1e-05, %v89_v51 }
  0xb5   :  { %156 = vrsqrt.f32 %v95_v53 }
  0xba   :  { %v151_v55 = vpop.eup %150 }
  0xbc   :  { %v153_v57 = vpop.eup %152 }
  0xbd   :  { %v155_v58 = vpop.eup %154 }
  0xbe   :  { %v102_v62 = vsel %vm33_vm1, %v151_v55, %v155_v58 }
  0xbf   :  { %v108_v4 = vmul.f32 %v106_v59, %v102_v62 }
  0xc1   :  { %v116_v3 = vmul.f32 %v144_v63, %v108_v4 }
  0xc2   :  { %v157_v60 = vpop.eup %156 }
  0xc3   :  { %v101_v0 = vsel %vm33_vm1, %v153_v57, %v157_v60  ;;  %v124_v7 = vadd.f32 %v145_v5, %v116_v3 }
  0xc4   :  { %v107_v6 = vmul.f32 %v105_v61, %v101_v0 }
  0xc5   :  { %126 = vst.msk [vmem:[#allocation5 + $0x8] sm:$0xff] %vm40_vm0, %v124_v7 }
  0xc6   :  { %v115_v2 = vmul.f32 %v144_v63, %v107_v6 }
  0xc8   :  { %v123_v8 = vadd.f32 %v145_v5, %v115_v2 }
  0xca   :  { %125 = vst.msk [vmem:[#allocation5] sm:$0xff] %vm40_vm0, %v123_v8 }
  0xcb   :  { %189 = shalt.err (!%p186_p9)
}
  0xcc   :  { %138 = dma.vmem_to_hbm [thread:$0]  %s133_s23, 256, %s290_s3, [#allocation4], %s203_s15, %s203_s15, %s204_s16  }
  0xcd   :  { %200 = dma.done.wait [#allocation4], 256  }
  0xce   :  { %201 = vsyncadd [#allocation4], 4294967040 }
  0xcf   :  { %142 = vsyncpa [#allocation3], 1 }
  0xd0   :  { %143 = vsyncpa [#allocation4], 1 }

</bundles_post_ra>
